<compile_context>
chip_gen: v7x
topology: tpu7x:2x2x1
jax: 0.10.0
libtpu: 0.0.40
codegen_flags: <defaults>
</compile_context>

<pallas_src>
import functools

import jax
import jax.numpy as jnp
from jax.experimental import pallas as pl
from jax.experimental.pallas import tpu as pltpu

LANE = 128   # vreg lane width (v5e/v6e/v7x)
SUBLANE = 8  # f32 sublane granule


def _round_up(n, m):
    return ((n + m - 1) // m) * m


def _pad2d(a, rows, cols):
    return jnp.pad(a, ((0, rows - a.shape[0]), (0, cols - a.shape[1])))


def dqn_kernel(x_ref, w1_ref, b1_ref, w2_ref, b2_ref, w3_ref, b3_ref, o_ref):
    # x_ref: [in_pad, TB]   (features on sublanes, batch on lanes)
    # w*_ref: W^T padded to [out_feat_pad, in_feat_pad]; b*_ref: [out_feat_pad, 1]
    x = x_ref[...]
    # layer 1: Linear(input -> hidden) + ReLU
    h = jnp.dot(w1_ref[...], x, preferred_element_type=jnp.float32)
    h = jnp.maximum(h + b1_ref[...], 0.0)
    # layer 2: Linear(hidden -> hidden) + ReLU
    h = jnp.dot(w2_ref[...], h, preferred_element_type=jnp.float32)
    h = jnp.maximum(h + b2_ref[...], 0.0)
    # layer 3: Linear(hidden -> output); lane-dense store (TB is a 128-multiple).
    o = jnp.dot(w3_ref[...], h, preferred_element_type=jnp.float32)
    o_ref[...] = (o + b3_ref[...]).astype(o_ref.dtype)


@functools.partial(jax.jit, static_argnames=("tb",))
def dqn_forward(x, params, *, tb=2048):
    """DQN forward: x[B, input_size] -> [B, output_size].

    params = (w1[in,10], b1[1,10], w2[10,10], b2[1,10], w3[10,out], b3[1,out]),
    weights stored [fan_in, fan_out]; the wrapper transposes/pads them once.
    """
    w1, b1, w2, b2, w3, b3 = params
    B, in_size = x.shape
    hidden = w1.shape[1]
    out_size = w3.shape[1]

    # Feature dims pad only to the sublane granule (8); batch pads to lane tiles.
    in_pad = _round_up(in_size, SUBLANE)
    hid_pad = _round_up(hidden, SUBLANE)
    out_pad = _round_up(out_size, SUBLANE)

    # Batch tiling: tiles are multiples of 128 lanes; aim for TB <= tb and at
    # least 2 grid steps (v7x megacore) without rounding B up to a tb multiple.
    max_tiles = max(1, _round_up(B, LANE) // LANE)
    n_tiles = min(max_tiles, max(2, pl.cdiv(B, tb)))
    TB = _round_up(pl.cdiv(B, n_tiles), LANE)
    n_tiles = pl.cdiv(_round_up(B, LANE), TB)
    B_pad = TB * n_tiles

    # One small transpose+pad pass each for x and the (tiny) weights/biases.
    xT = _pad2d(x.astype(jnp.float32).T, in_pad, B_pad)              # [in_pad, B_pad]
    w1t = _pad2d(w1.T.astype(jnp.float32), hid_pad, in_pad)          # [hid_pad, in_pad]
    b1t = _pad2d(b1.reshape(-1, 1).astype(jnp.float32), hid_pad, 1)  # [hid_pad, 1]
    w2t = _pad2d(w2.T.astype(jnp.float32), hid_pad, hid_pad)
    b2t = _pad2d(b2.reshape(-1, 1).astype(jnp.float32), hid_pad, 1)
    w3t = _pad2d(w3.T.astype(jnp.float32), out_pad, hid_pad)
    b3t = _pad2d(b3.reshape(-1, 1).astype(jnp.float32), out_pad, 1)

    # Weights/biases: constant block index -> stay resident in VMEM across steps.
    resident = lambda a: pl.BlockSpec(a.shape, lambda i: (0, 0))

    # Padded (= actual) flops / bytes for the scheduler.
    flops = 2 * B_pad * (in_pad * hid_pad + hid_pad * hid_pad + hid_pad * out_pad)
    bytes_accessed = 4 * (
        B_pad * (in_pad + out_pad)                      # x^T in, out^T back
        + hid_pad * (in_pad + hid_pad) + out_pad * hid_pad   # weights
        + 2 * hid_pad + out_pad)                        # biases

    outT = pl.pallas_call(
        dqn_kernel,
        out_shape=jax.ShapeDtypeStruct((out_pad, B_pad), jnp.float32),
        grid=(n_tiles,),
        in_specs=[
            pl.BlockSpec((in_pad, TB), lambda i: (0, i)),   # x^T: batch-tiled on lanes
            resident(w1t), resident(b1t),
            resident(w2t), resident(b2t),
            resident(w3t), resident(b3t),
        ],
        out_specs=pl.BlockSpec((out_pad, TB), lambda i: (0, i)),
        compiler_params=pltpu.CompilerParams(
            dimension_semantics=("parallel",)),
        cost_estimate=pl.CostEstimate(
            flops=flops, transcendentals=0, bytes_accessed=bytes_accessed),
    )(xT, w1t, b1t, w2t, b2t, w3t, b3t)

    # Strip feature/batch padding and return to [B, out] layout.
    return outT[:out_size, :B].T


def init_dqn_params(key, input_size, output_size, hidden=10):
    """Mirror the PyTorch module: weights ~ Normal(0, 0.1); biases keep
    nn.Linear's default Uniform(-1/sqrt(fan_in), 1/sqrt(fan_in))."""
    ks = jax.random.split(key, 6)

    def linear(kw, kb, fan_in, fan_out):
        w = 0.1 * jax.random.normal(kw, (fan_in, fan_out), dtype=jnp.float32)
        bound = 1.0 / (fan_in ** 0.5)
        b = jax.random.uniform(kb, (1, fan_out), dtype=jnp.float32,
                               minval=-bound, maxval=bound)
        return w, b

    w1, b1 = linear(ks[0], ks[1], input_size, hidden)
    w2, b2 = linear(ks[2], ks[3], hidden, hidden)
    w3, b3 = linear(ks[4], ks[5], hidden, output_size)
    return (w1, b1, w2, b2, w3, b3)


def dqn_reference(x, params):
    w1, b1, w2, b2, w3, b3 = params
    h = jnp.maximum(x @ w1 + b1, 0.0)
    h = jnp.maximum(h @ w2 + b2, 0.0)
    return h @ w3 + b3


if __name__ == "__main__":
    key = jax.random.PRNGKey(0)
    k_x, k_p = jax.random.split(key)

    batch, input_size, output_size = 2, 4, 3
    x = jax.random.normal(k_x, (batch, input_size), dtype=jnp.float32)
    params = init_dqn_params(k_p, input_size, output_size)

    out = dqn_forward(x, params)
    out = jax.block_until_ready(out)

    ref = dqn_reference(x, params)
    assert out.shape == (batch, output_size)
    assert jnp.allclose(out, ref, atol=1e-5, rtol=1e-5)

    print("KERNEL_OK")
</pallas_src>

<mosaic_0001>
module attributes {stable_mosaic.version = 11 : i64} {
  func.func @dqn_kernel(%arg0: i32, %arg1: memref<8x128xf32, #tpu.memory_space<vmem>>, %arg2: memref<16x8xf32, #tpu.memory_space<vmem>>, %arg3: memref<16x1xf32, #tpu.memory_space<vmem>>, %arg4: memref<16x16xf32, #tpu.memory_space<vmem>>, %arg5: memref<16x1xf32, #tpu.memory_space<vmem>>, %arg6: memref<8x16xf32, #tpu.memory_space<vmem>>, %arg7: memref<8x1xf32, #tpu.memory_space<vmem>>, %arg8: memref<8x128xf32, #tpu.memory_space<vmem>>) attributes {dimension_semantics = [#tpu.dimension_semantics<parallel>], iteration_bounds = array<i64: 1>, scalar_prefetch = 0 : i64, scratch_operands = 0 : i64, tpu.core_type = #tpu.core_type<tc>, window_params = [{transform_indices = @transform_0, window_bounds = array<i64: 8, 128>}, {pipeline_mode = #tpu.pipeline_mode<synchronous>, transform_indices = @transform_1, window_bounds = array<i64: 16, 8>}, {pipeline_mode = #tpu.pipeline_mode<synchronous>, transform_indices = @transform_2, window_bounds = array<i64: 16, 1>}, {pipeline_mode = #tpu.pipeline_mode<synchronous>, transform_indices = @transform_3, window_bounds = array<i64: 16, 16>}, {pipeline_mode = #tpu.pipeline_mode<synchronous>, transform_indices = @transform_4, window_bounds = array<i64: 16, 1>}, {pipeline_mode = #tpu.pipeline_mode<synchronous>, transform_indices = @transform_5, window_bounds = array<i64: 8, 16>}, {pipeline_mode = #tpu.pipeline_mode<synchronous>, transform_indices = @transform_6, window_bounds = array<i64: 8, 1>}, {transform_indices = @transform_7, window_bounds = array<i64: 8, 128>}]} {
    %c0 = arith.constant 0 : index
    %c0_0 = arith.constant 0 : index
    %0 = vector.load %arg1[%c0, %c0_0] : memref<8x128xf32, #tpu.memory_space<vmem>>, vector<8x128xf32>
    %c0_1 = arith.constant 0 : index
    %c0_2 = arith.constant 0 : index
    %1 = vector.load %arg2[%c0_1, %c0_2] : memref<16x8xf32, #tpu.memory_space<vmem>>, vector<16x8xf32>
    %cst = arith.constant dense<0.000000e+00> : vector<16x128xf32>
    %2 = tpu.matmul %1, %0, %cst {dimension_numbers = #tpu.dot_dimension_numbers<[1], [0], [0], [1], [0, 0, 1, 1], [], []>} : vector<16x8xf32>, vector<8x128xf32>, vector<16x128xf32> -> vector<16x128xf32>
    %c0_3 = arith.constant 0 : index
    %c0_4 = arith.constant 0 : index
    %3 = vector.load %arg3[%c0_3, %c0_4] : memref<16x1xf32, #tpu.memory_space<vmem>>, vector<16x1xf32>
    %4 = vector.broadcast %3 : vector<16x1xf32> to vector<16x128xf32>
    %5 = arith.addf %2, %4 : vector<16x128xf32>
    %cst_5 = arith.constant 0.000000e+00 : f32
    %6 = vector.broadcast %cst_5 : f32 to vector<16x128xf32>
    %7 = arith.maximumf %5, %6 : vector<16x128xf32>
    %c0_6 = arith.constant 0 : index
    %c0_7 = arith.constant 0 : index
    %8 = vector.load %arg4[%c0_6, %c0_7] : memref<16x16xf32, #tpu.memory_space<vmem>>, vector<16x16xf32>
    %cst_8 = arith.constant dense<0.000000e+00> : vector<16x128xf32>
    %9 = tpu.matmul %8, %7, %cst_8 {dimension_numbers = #tpu.dot_dimension_numbers<[1], [0], [0], [1], [0, 0, 1, 1], [], []>} : vector<16x16xf32>, vector<16x128xf32>, vector<16x128xf32> -> vector<16x128xf32>
    %c0_9 = arith.constant 0 : index
    %c0_10 = arith.constant 0 : index
    %10 = vector.load %arg5[%c0_9, %c0_10] : memref<16x1xf32, #tpu.memory_space<vmem>>, vector<16x1xf32>
    %11 = vector.broadcast %10 : vector<16x1xf32> to vector<16x128xf32>
    %12 = arith.addf %9, %11 : vector<16x128xf32>
    %cst_11 = arith.constant 0.000000e+00 : f32
    %13 = vector.broadcast %cst_11 : f32 to vector<16x128xf32>
    %14 = arith.maximumf %12, %13 : vector<16x128xf32>
    %c0_12 = arith.constant 0 : index
    %c0_13 = arith.constant 0 : index
    %15 = vector.load %arg6[%c0_12, %c0_13] : memref<8x16xf32, #tpu.memory_space<vmem>>, vector<8x16xf32>
    %cst_14 = arith.constant dense<0.000000e+00> : vector<8x128xf32>
    %16 = tpu.matmul %15, %14, %cst_14 {dimension_numbers = #tpu.dot_dimension_numbers<[1], [0], [0], [1], [0, 0, 1, 1], [], []>} : vector<8x16xf32>, vector<16x128xf32>, vector<8x128xf32> -> vector<8x128xf32>
    %c0_15 = arith.constant 0 : index
    %c0_16 = arith.constant 0 : index
    %17 = vector.load %arg7[%c0_15, %c0_16] : memref<8x1xf32, #tpu.memory_space<vmem>>, vector<8x1xf32>
    %18 = vector.broadcast %17 : vector<8x1xf32> to vector<8x128xf32>
    %19 = arith.addf %16, %18 : vector<8x128xf32>
    %c0_17 = arith.constant 0 : index
    %c0_18 = arith.constant 0 : index
    %20 = vector.load %arg8[%c0_17, %c0_18] : memref<8x128xf32, #tpu.memory_space<vmem>>, vector<8x128xf32>
    tpu.vector_store %arg8[%c0_17, %c0_18], %19 {strides = array<i32>} : memref<8x128xf32, #tpu.memory_space<vmem>>, vector<8x128xf32>,
    return
  }
  func.func @transform_0(%arg0: i32) -> (i32, i32) {
    %c0_i32 = arith.constant 0 : i32
    %c0_i32_0 = arith.constant 0 : i32
    return %c0_i32, %arg0 : i32, i32
  }
  func.func @transform_1(%arg0: i32) -> (i32, i32) {
    %c0_i32 = arith.constant 0 : i32
    %c0_i32_0 = arith.constant 0 : i32
    %c0_i32_1 = arith.constant 0 : i32
    return %c0_i32, %c0_i32_0 : i32, i32
  }
  func.func @transform_2(%arg0: i32) -> (i32, i32) {
    %c0_i32 = arith.constant 0 : i32
    %c0_i32_0 = arith.constant 0 : i32
    %c0_i32_1 = arith.constant 0 : i32
    return %c0_i32, %c0_i32_0 : i32, i32
  }
  func.func @transform_3(%arg0: i32) -> (i32, i32) {
    %c0_i32 = arith.constant 0 : i32
    %c0_i32_0 = arith.constant 0 : i32
    %c0_i32_1 = arith.constant 0 : i32
    return %c0_i32, %c0_i32_0 : i32, i32
  }
  func.func @transform_4(%arg0: i32) -> (i32, i32) {
    %c0_i32 = arith.constant 0 : i32
    %c0_i32_0 = arith.constant 0 : i32
    %c0_i32_1 = arith.constant 0 : i32
    return %c0_i32, %c0_i32_0 : i32, i32
  }
  func.func @transform_5(%arg0: i32) -> (i32, i32) {
    %c0_i32 = arith.constant 0 : i32
    %c0_i32_0 = arith.constant 0 : i32
    %c0_i32_1 = arith.constant 0 : i32
    return %c0_i32, %c0_i32_0 : i32, i32
  }
  func.func @transform_6(%arg0: i32) -> (i32, i32) {
    %c0_i32 = arith.constant 0 : i32
    %c0_i32_0 = arith.constant 0 : i32
    %c0_i32_1 = arith.constant 0 : i32
    return %c0_i32, %c0_i32_0 : i32, i32
  }
  func.func @transform_7(%arg0: i32) -> (i32, i32) {
    %c0_i32 = arith.constant 0 : i32
    %c0_i32_0 = arith.constant 0 : i32
    return %c0_i32, %arg0 : i32, i32
  }
}

</mosaic_0001>

<bundles_post_ra>
// kernel: dqn_forward.1
= control target key start
LH: loop header
LB: loop body
LE: loop exit
PB: predicated region body
PF: predicated region fallthrough
CT: control target
= control target key end

     0   :  { %vm41_vm0 = vcmask 64512   ;;  %v355_v3 = vmov 0   ;;  %vm139_vm1 = vcmask 130048   ;;  %v356_v20 = vmov 0.0|0.0   ;;  %s438_s0 = inlined_call_operand.vmem [shape: f32[8,128], index: 0, kind: input, shape index: {}]   ;;  %s439_s1 = inlined_call_operand.vmem [shape: f32[16,8], index: 1, kind: input, shape index: {}]   ;;  %s440_s2 = inlined_call_operand.vmem [shape: f32[16,1], index: 2, kind: input, shape index: {}]   ;;  %s441_s6 = inlined_call_operand.vmem [shape: f32[8,1], index: 6, kind: input, shape index: {}]   ;;  %s442_s3 = inlined_call_operand.vmem [shape: f32[16,16], index: 3, kind: input, shape index: {}]   ;;  %s443_s4 = inlined_call_operand.vmem [shape: f32[16,1], index: 4, kind: input, shape index: {}]   ;;  %s444_s5 = inlined_call_operand.vmem [shape: f32[8,16], index: 5, kind: input, shape index: {}]   ;;  %s445_s7 = inlined_call_operand.vmem [shape: f32[8,128], index: 7, kind: output, shape index: {}]  }
   0x1   :  { %v26_v0 = vld [vmem:[%s438_s0] sm:$0xff]  ;;  %v28_v2 = vld [vmem:[%s439_s1 + $0x8] sm:$0xff]  ;;  %353 = vset.pattern.permute.xlu0 %v355_v3  ;;  %354 = vset.pattern.permute.xlu1 %v355_v3  ;;  %vm357_vm2 = vmmov 0   ;;  %v358_v21 = vmov 0.0  }
   0x2   :  { %v27_v1 = vld [vmem:[%s439_s1] sm:$0xff]  ;;  %323 = vmatprep.subr.mxu0 %v26_v0  ;;  %v30_v5 = vld [vmem:[%s440_s2 + $0x8] sm:$0xff] }
   0x3   :  { %325 = vmatprep.mubr.msk.f32.mxu0 %vm41_vm0, %v27_v1  ;;  %v29_v4 = vld [vmem:[%s440_s2] sm:$0xff]  ;;  %324 = vmatpush3.msra.mxu0 %v26_v0  ;;  %v128_v9 = vld [vmem:[%s443_s4 + $0x8] sm:$0xff] }
   0x4   :  { %33 = vperm.xlu0 %353, %v29_v4   ;;  %326 = vmatmul.mubr.msk.f32.vlgmr.msra.gmra.mrb[0].mxu0 %vm41_vm0, %v28_v2  ;;  %v224_v6 = vld [vmem:[%s441_s6] sm:$0xff]  ;;  %v126_v19 = vld [vmem:[%s442_s3 + $0x8] sm:$0xff] }
   0x5   :  { %v125_v7 = vld [vmem:[%s442_s3] sm:$0xff]  ;;  %346 = vmatprep.subr.bf16.mxu0 %v356_v20  ;;  %339 = vmatprep.mubr.msk.f32.mxu0 %vm357_vm2, %v358_v21 }
   0x6   :  { %332 = vmatprep.mubr.msk.f32.mxu1 %vm139_vm1, %v125_v7  ;;  %v127_v8 = vld [vmem:[%s443_s4] sm:$0xff] }
   0x7   :  { %131 = vperm.xlu1 %354, %v127_v8   ;;  %v223_v31 = vld [vmem:[%s444_s5] sm:$0xff] }
   0x8   :  { %38 = vperm.xlu0 %353, %v30_v5  }
   0xb   :  { %136 = vperm.xlu1 %354, %v128_v9  }
   0xc   :  { %227 = vperm.xlu0 %353, %v224_v6  }
  0x83   :  { %v34_v10 = vpop.permute.xlu0 %33 }
  0x86   :  { %v132_v22 = vpop.permute.xlu1 %131 }
  0x87   :  { %v39_v11 = vpop.permute.xlu0 %38 }
  0x8a   :  { %v137_v23 = vpop.permute.xlu1 %136 }
  0x8b   :  { %v228_v32 = vpop.permute.xlu0 %227 }
  0xd7   :  { %v327_v12 = vpop.f32.mrb[0].mxu0 }
  0xd8   :  { %v120_v13 = vadd.f32 %v327_v12, %v39_v11  ;;  %v114_v14 = vpop.f32.mrb[1].mxu0 }
  0xd9   :  { %v115_v15 = vadd.f32 %v114_v14, %v34_v10 }
  0xda   :  { %v124_v16 = vmax.f32 %v120_v13, 0.0 }
  0xdb   :  { %v123_v17 = vmax.f32 %v115_v15, 0.0 }
  0xdd   :  { %v342_v18 = vpack.c.bf16 %v124_v16, %v123_v17 }
  0xdf   :  { %343 = vmatprep.subr.bf16.mxu1 %v342_v18 }
  0xe0   :  { %345 = vmatpush3.bf16.msra.mxu1 %v342_v18 }
  0xe3   :  { %333 = vmatmul.mubr.msk.f32.vlgmr.msra.gmra.mrb[0].mxu1 %vm139_vm1, %v126_v19 }
 0x1b6   :  { %v334_v24 = vpop.f32.mrb[0].mxu1 }
 0x1b7   :  { %v218_v25 = vadd.f32 %v334_v24, %v137_v23  ;;  %v212_v26 = vpop.f32.mrb[1].mxu1 }
 0x1b8   :  { %v213_v27 = vadd.f32 %v212_v26, %v132_v22 }
 0x1b9   :  { %v222_v28 = vmax.f32 %v218_v25, 0.0 }
 0x1ba   :  { %v221_v29 = vmax.f32 %v213_v27, 0.0 }
 0x1bc   :  { %v347_v30 = vpack.c.bf16 %v222_v28, %v221_v29 }
 0x1be   :  { %348 = vmatpush3.bf16.msra.mxu0 %v347_v30 }
 0x1c1   :  { %340 = vmatmul.mubr.msk.f32.vlgmr.msra.gmra.mrb[2].mxu0 %vm139_vm1, %v223_v31 }
 0x294   :  { %v299_v33 = vpop.f32.mrb[2].mxu0 }
 0x295   :  { %v300_v34 = vadd.f32 %v299_v33, %v228_v32  ;;  %v341_v35 = vpop.f32.mrb[3].mxu0 }
 0x297   :  { %303 = vst [vmem:[%s445_s7] sm:$0xff] %v300_v34 }

</bundles_post_ra>
